<compile_context>
chip_gen: v7x
topology: tpu7x:2x2x1
jax: 0.10.0
libtpu: 0.0.40
codegen_flags: <defaults>
</compile_context>

<pallas_src>
import functools

import jax
import jax.numpy as jnp
from jax.experimental import pallas as pl
from jax.experimental.pallas import tpu as pltpu

LOG_SIG_MAX = 2.0
LOG_SIG_MIN = -20.0


def _policy_kernel(state_ref,
                   w1_ref, b1_ref,
                   w2_ref, b2_ref,
                   wh_ref, bh_ref,
                   bounds_ref,
                   out_ref):
    """One batch-tile of the SAC GaussianPolicy MLP.

    out_ref[:, :A]     = mean
    out_ref[:, A:2A]   = clamp(log_std, LOG_SIG_MIN, LOG_SIG_MAX)
    out_ref[:, 2A:]    = 0 (lane padding)
    """
    x = state_ref[...]  # [tile_b, num_inputs], f32

    # linear1 + ReLU
    h1 = jnp.dot(x, w1_ref[...], preferred_element_type=jnp.float32) + b1_ref[...]
    h1 = jnp.maximum(h1, 0.0)

    # linear2 + ReLU
    h2 = jnp.dot(h1, w2_ref[...], preferred_element_type=jnp.float32) + b2_ref[...]
    h2 = jnp.maximum(h2, 0.0)

    # fused heads: [mean | log_std | 0-pad] in one lane-dense MXU pass
    y = jnp.dot(h2, wh_ref[...], preferred_element_type=jnp.float32) + bh_ref[...]

    # Per-lane clamp against precomputed bounds rows (mean lanes: +/-inf).
    lo = bounds_ref[0:1, :]
    hi = bounds_ref[1:2, :]
    out_ref[...] = jnp.minimum(jnp.maximum(y, lo), hi).astype(out_ref.dtype)


def _round_up(x, m):
    return ((x + m - 1) // m) * m


def _cdiv(a, b):
    return (a + b - 1) // b


def _const_spec(shape):
    """BlockSpec for a grid-invariant operand (single pipeline buffer)."""
    index_map = lambda i: (0,) * len(shape)
    try:
        return pl.BlockSpec(shape, index_map, pipeline_mode=pl.Buffered(buffer_count=1))
    except TypeError:  # older BlockSpec without pipeline_mode kwarg
        return pl.BlockSpec(shape, index_map)


@jax.jit
def gaussian_policy_forward(state, params):
    """Pallas-backed GaussianPolicy.forward. Returns (mean, log_std)."""
    B, num_inputs = state.shape
    H = params["w1"].shape[1]
    A = params["wm"].shape[1]
    out_pad = params["wh_pad"].shape[1]          # round_up(2A, 128), built at init

    # ---- batch tiling / VMEM audit (all static Python at trace time) -------
    MAX_TILE = 512            # largest batch tile per grid step
    SINGLE_TILE_MAX = 256     # below this, one grid step (per-step overhead dominates)
    VMEM_BUDGET = 32 * 1024 * 1024   # safe on v5e/v6e/v7x

    padded_B = _round_up(B, 8)

    weight_bytes = 4 * (num_inputs * H + H          # w1, b1 (single-buffered)
                        + H * H + H                 # w2, b2
                        + H * out_pad + out_pad     # fused head
                        + 2 * out_pad)              # bounds
    per_row_bytes = 4 * 2 * (num_inputs + out_pad)  # double-buffered state + output

    tile_cap = max(8, ((VMEM_BUDGET - weight_bytes) // max(per_row_bytes, 1)) // 8 * 8)
    tile_cap = min(tile_cap, MAX_TILE)

    if padded_B <= min(SINGLE_TILE_MAX, tile_cap):
        tile_b = padded_B
        num_tiles = 1
    else:
        # >= 2 grid steps so ("parallel",) shards across both v7x TensorCores;
        # padding stays 8-aligned-ish (no round_up to a multiple of 512).
        num_tiles = max(2, _cdiv(padded_B, tile_cap))
        tile_b = min(tile_cap, _round_up(_cdiv(padded_B, num_tiles), 8))
        num_tiles = _cdiv(padded_B, tile_b)
        padded_B = num_tiles * tile_b

    if padded_B != B:
        state_in = jnp.zeros((padded_B, num_inputs), state.dtype).at[:B].set(state)
    else:
        state_in = state

    vmem_limit = int(min(60 * 1024 * 1024,
                         max(32 * 1024 * 1024,
                             weight_bytes + tile_b * per_row_bytes + (4 << 20))))

    flops = 2 * padded_B * (num_inputs * H + H * H + H * out_pad)
    bytes_accessed = 4 * (padded_B * num_inputs + padded_B * out_pad) + weight_bytes
    cost = pl.CostEstimate(flops=flops, transcendentals=0,
                           bytes_accessed=bytes_accessed)

    out = pl.pallas_call(
        _policy_kernel,
        out_shape=jax.ShapeDtypeStruct((padded_B, out_pad), jnp.float32),
        grid=(num_tiles,),
        in_specs=[
            pl.BlockSpec((tile_b, num_inputs), lambda i: (i, 0)),
            _const_spec((num_inputs, H)),
            _const_spec((1, H)),
            _const_spec((H, H)),
            _const_spec((1, H)),
            _const_spec((H, out_pad)),
            _const_spec((1, out_pad)),
            _const_spec((2, out_pad)),
        ],
        out_specs=pl.BlockSpec((tile_b, out_pad), lambda i: (i, 0)),
        compiler_params=pltpu.CompilerParams(
            dimension_semantics=("parallel",),
            vmem_limit_bytes=vmem_limit),
        cost_estimate=cost,
    )(state_in, params["w1"], params["b1"], params["w2"], params["b2"],
      params["wh_pad"], params["bh_pad"], params["bounds"])

    mean = out[:B, :A]
    log_std = out[:B, A:2 * A]
    return mean, log_std


def xavier_uniform(key, fan_in, fan_out, gain=1.0):
    # Matches torch.nn.init.xavier_uniform_ (gain=1): U(-a, a), a = sqrt(6/(in+out)).
    limit = gain * jnp.sqrt(6.0 / (fan_in + fan_out))
    # Stored as (in, out) so the kernel can do x @ W directly.
    return jax.random.uniform(key, (fan_in, fan_out), jnp.float32, -limit, limit)


def fuse_head_params(params, num_actions):
    """Build the fused, 128-lane-padded head weight/bias and clamp bounds.

    Called once at init (or whenever wm/ws/bm/bs are updated), NOT per forward.
    """
    H = params["wm"].shape[0]
    A = num_actions
    out_pad = _round_up(2 * A, 128)

    wh = jnp.zeros((H, out_pad), jnp.float32)
    wh = wh.at[:, :A].set(params["wm"]).at[:, A:2 * A].set(params["ws"])
    bh = jnp.zeros((1, out_pad), jnp.float32)
    bh = bh.at[:, :A].set(params["bm"]).at[:, A:2 * A].set(params["bs"])

    lo = jnp.full((out_pad,), -jnp.inf, jnp.float32)
    hi = jnp.full((out_pad,), jnp.inf, jnp.float32)
    lo = lo.at[A:2 * A].set(LOG_SIG_MIN).at[2 * A:].set(0.0)
    hi = hi.at[A:2 * A].set(LOG_SIG_MAX).at[2 * A:].set(0.0)
    bounds = jnp.stack([lo, hi], axis=0)  # (2, out_pad)

    params = dict(params)
    params["wh_pad"] = wh
    params["bh_pad"] = bh
    params["bounds"] = bounds
    return params


def init_params(key, num_inputs, num_actions, hidden_dim):
    k1, k2, k3, k4 = jax.random.split(key, 4)
    params = {
        "w1": xavier_uniform(k1, num_inputs, hidden_dim),
        "b1": jnp.zeros((1, hidden_dim), jnp.float32),
        "w2": xavier_uniform(k2, hidden_dim, hidden_dim),
        "b2": jnp.zeros((1, hidden_dim), jnp.float32),
        "wm": xavier_uniform(k3, hidden_dim, num_actions),
        "bm": jnp.zeros((1, num_actions), jnp.float32),
        "ws": xavier_uniform(k4, hidden_dim, num_actions),
        "bs": jnp.zeros((1, num_actions), jnp.float32),
    }
    return fuse_head_params(params, num_actions)


def reference_forward(state, params):
    h1 = jnp.maximum(state @ params["w1"] + params["b1"], 0.0)
    h2 = jnp.maximum(h1 @ params["w2"] + params["b2"], 0.0)
    mean = h2 @ params["wm"] + params["bm"]
    log_std = jnp.clip(h2 @ params["ws"] + params["bs"], LOG_SIG_MIN, LOG_SIG_MAX)
    return mean, log_std


if __name__ == "__main__":
    key = jax.random.PRNGKey(0)
    k_param, k_state = jax.random.split(key)

    batch = 8
    num_inputs = 16
    num_actions = 8
    hidden_dim = 32

    params = init_params(k_param, num_inputs, num_actions, hidden_dim)
    state = jax.random.normal(k_state, (batch, num_inputs), jnp.float32)

    mean, log_std = gaussian_policy_forward(state, params)
    jax.block_until_ready((mean, log_std))

    ref_mean, ref_log_std = reference_forward(state, params)
    assert mean.shape == (batch, num_actions)
    assert log_std.shape == (batch, num_actions)
    assert jnp.allclose(mean, ref_mean, atol=1e-5, rtol=1e-5)
    assert jnp.allclose(log_std, ref_log_std, atol=1e-5, rtol=1e-5)

    # Batch-padding path (B not a multiple of 8).
    state5 = jax.random.normal(jax.random.PRNGKey(1), (5, num_inputs), jnp.float32)
    m5, s5 = gaussian_policy_forward(state5, params)
    jax.block_until_ready((m5, s5))
    rm5, rs5 = reference_forward(state5, params)
    assert jnp.allclose(m5, rm5, atol=1e-5, rtol=1e-5)
    assert jnp.allclose(s5, rs5, atol=1e-5, rtol=1e-5)

    # Multi-tile path (B large enough that the grid has >= 2 parallel steps).
    state600 = jax.random.normal(jax.random.PRNGKey(2), (600, num_inputs), jnp.float32)
    m600, s600 = gaussian_policy_forward(state600, params)
    jax.block_until_ready((m600, s600))
    rm600, rs600 = reference_forward(state600, params)
    assert jnp.allclose(m600, rm600, atol=1e-5, rtol=1e-5)
    assert jnp.allclose(s600, rs600, atol=1e-5, rtol=1e-5)

    # TODO(synk): sample() (Normal.rsample + tanh squashing + log_prob) is
    # stochastic host-level glue around the deterministic forward(); only the
    # forward() hot path is implemented as a kernel here.

    print("KERNEL_OK")
</pallas_src>

<mosaic_0001>
module attributes {stable_mosaic.version = 11 : i64} {
  func.func @_policy_kernel(%arg0: i32, %arg1: memref<8x16xf32, #tpu.memory_space<vmem>>, %arg2: memref<16x32xf32, #tpu.memory_space<vmem>>, %arg3: memref<1x32xf32, #tpu.memory_space<vmem>>, %arg4: memref<32x32xf32, #tpu.memory_space<vmem>>, %arg5: memref<1x32xf32, #tpu.memory_space<vmem>>, %arg6: memref<32x128xf32, #tpu.memory_space<vmem>>, %arg7: memref<1x128xf32, #tpu.memory_space<vmem>>, %arg8: memref<2x128xf32, #tpu.memory_space<vmem>>, %arg9: memref<8x128xf32, #tpu.memory_space<vmem>>) attributes {dimension_semantics = [#tpu.dimension_semantics<parallel>], iteration_bounds = array<i64: 1>, scalar_prefetch = 0 : i64, scratch_operands = 0 : i64, tpu.core_type = #tpu.core_type<tc>, window_params = [{transform_indices = @transform_0, window_bounds = array<i64: 8, 16>}, {pipeline_mode = #tpu.pipeline_mode<synchronous>, transform_indices = @transform_1, window_bounds = array<i64: 16, 32>}, {pipeline_mode = #tpu.pipeline_mode<synchronous>, transform_indices = @transform_2, window_bounds = array<i64: 1, 32>}, {pipeline_mode = #tpu.pipeline_mode<synchronous>, transform_indices = @transform_3, window_bounds = array<i64: 32, 32>}, {pipeline_mode = #tpu.pipeline_mode<synchronous>, transform_indices = @transform_4, window_bounds = array<i64: 1, 32>}, {pipeline_mode = #tpu.pipeline_mode<synchronous>, transform_indices = @transform_5, window_bounds = array<i64: 32, 128>}, {pipeline_mode = #tpu.pipeline_mode<synchronous>, transform_indices = @transform_6, window_bounds = array<i64: 1, 128>}, {pipeline_mode = #tpu.pipeline_mode<synchronous>, transform_indices = @transform_7, window_bounds = array<i64: 2, 128>}, {transform_indices = @transform_8, window_bounds = array<i64: 8, 128>}]} {
    %c0 = arith.constant 0 : index
    %c0_0 = arith.constant 0 : index
    %0 = vector.load %arg1[%c0, %c0_0] : memref<8x16xf32, #tpu.memory_space<vmem>>, vector<8x16xf32>
    %c0_1 = arith.constant 0 : index
    %c0_2 = arith.constant 0 : index
    %1 = vector.load %arg2[%c0_1, %c0_2] : memref<16x32xf32, #tpu.memory_space<vmem>>, vector<16x32xf32>
    %cst = arith.constant dense<0.000000e+00> : vector<8x32xf32>
    %2 = tpu.matmul %0, %1, %cst {dimension_numbers = #tpu.dot_dimension_numbers<[1], [0], [0], [1], [0, 0, 1, 1], [], []>} : vector<8x16xf32>, vector<16x32xf32>, vector<8x32xf32> -> vector<8x32xf32>
    %c0_3 = arith.constant 0 : index
    %c0_4 = arith.constant 0 : index
    %3 = vector.load %arg3[%c0_3, %c0_4] : memref<1x32xf32, #tpu.memory_space<vmem>>, vector<1x32xf32>
    %4 = vector.broadcast %3 : vector<1x32xf32> to vector<8x32xf32>
    %5 = arith.addf %2, %4 : vector<8x32xf32>
    %cst_5 = arith.constant 0.000000e+00 : f32
    %6 = vector.broadcast %cst_5 : f32 to vector<8x32xf32>
    %7 = arith.maximumf %5, %6 : vector<8x32xf32>
    %c0_6 = arith.constant 0 : index
    %c0_7 = arith.constant 0 : index
    %8 = vector.load %arg4[%c0_6, %c0_7] : memref<32x32xf32, #tpu.memory_space<vmem>>, vector<32x32xf32>
    %cst_8 = arith.constant dense<0.000000e+00> : vector<8x32xf32>
    %9 = tpu.matmul %7, %8, %cst_8 {dimension_numbers = #tpu.dot_dimension_numbers<[1], [0], [0], [1], [0, 0, 1, 1], [], []>} : vector<8x32xf32>, vector<32x32xf32>, vector<8x32xf32> -> vector<8x32xf32>
    %c0_9 = arith.constant 0 : index
    %c0_10 = arith.constant 0 : index
    %10 = vector.load %arg5[%c0_9, %c0_10] : memref<1x32xf32, #tpu.memory_space<vmem>>, vector<1x32xf32>
    %11 = vector.broadcast %10 : vector<1x32xf32> to vector<8x32xf32>
    %12 = arith.addf %9, %11 : vector<8x32xf32>
    %cst_11 = arith.constant 0.000000e+00 : f32
    %13 = vector.broadcast %cst_11 : f32 to vector<8x32xf32>
    %14 = arith.maximumf %12, %13 : vector<8x32xf32>
    %c0_12 = arith.constant 0 : index
    %c0_13 = arith.constant 0 : index
    %15 = vector.load %arg6[%c0_12, %c0_13] : memref<32x128xf32, #tpu.memory_space<vmem>>, vector<32x128xf32>
    %cst_14 = arith.constant dense<0.000000e+00> : vector<8x128xf32>
    %16 = tpu.matmul %14, %15, %cst_14 {dimension_numbers = #tpu.dot_dimension_numbers<[1], [0], [0], [1], [0, 0, 1, 1], [], []>} : vector<8x32xf32>, vector<32x128xf32>, vector<8x128xf32> -> vector<8x128xf32>
    %c0_15 = arith.constant 0 : index
    %c0_16 = arith.constant 0 : index
    %17 = vector.load %arg7[%c0_15, %c0_16] : memref<1x128xf32, #tpu.memory_space<vmem>>, vector<1x128xf32>
    %18 = vector.broadcast %17 : vector<1x128xf32> to vector<8x128xf32>
    %19 = arith.addf %16, %18 : vector<8x128xf32>
    %c0_17 = arith.constant 0 : index
    %c0_18 = arith.constant 0 : index
    %20 = vector.load %arg8[%c0_17, %c0_18] : memref<2x128xf32, #tpu.memory_space<vmem>>, vector<1x128xf32>
    %c1 = arith.constant 1 : index
    %c0_19 = arith.constant 0 : index
    %21 = vector.load %arg8[%c1, %c0_19] : memref<2x128xf32, #tpu.memory_space<vmem>>, vector<1x128xf32>
    %22 = vector.broadcast %20 : vector<1x128xf32> to vector<8x128xf32>
    %23 = arith.maximumf %19, %22 : vector<8x128xf32>
    %24 = vector.broadcast %21 : vector<1x128xf32> to vector<8x128xf32>
    %25 = arith.minimumf %23, %24 : vector<8x128xf32>
    %c0_20 = arith.constant 0 : index
    %c0_21 = arith.constant 0 : index
    %26 = vector.load %arg9[%c0_20, %c0_21] : memref<8x128xf32, #tpu.memory_space<vmem>>, vector<8x128xf32>
    tpu.vector_store %arg9[%c0_20, %c0_21], %25 {strides = array<i32>} : memref<8x128xf32, #tpu.memory_space<vmem>>, vector<8x128xf32>,
    return
  }
  func.func @transform_0(%arg0: i32) -> (i32, i32) {
    %c0_i32 = arith.constant 0 : i32
    %c0_i32_0 = arith.constant 0 : i32
    return %arg0, %c0_i32 : i32, i32
  }
  func.func @transform_1(%arg0: i32) -> (i32, i32) {
    %c0_i32 = arith.constant 0 : i32
    %c0_i32_0 = arith.constant 0 : i32
    %c0_i32_1 = arith.constant 0 : i32
    return %c0_i32, %c0_i32_0 : i32, i32
  }
  func.func @transform_2(%arg0: i32) -> (i32, i32) {
    %c0_i32 = arith.constant 0 : i32
    %c0_i32_0 = arith.constant 0 : i32
    %c0_i32_1 = arith.constant 0 : i32
    return %c0_i32, %c0_i32_0 : i32, i32
  }
  func.func @transform_3(%arg0: i32) -> (i32, i32) {
    %c0_i32 = arith.constant 0 : i32
    %c0_i32_0 = arith.constant 0 : i32
    %c0_i32_1 = arith.constant 0 : i32
    return %c0_i32, %c0_i32_0 : i32, i32
  }
  func.func @transform_4(%arg0: i32) -> (i32, i32) {
    %c0_i32 = arith.constant 0 : i32
    %c0_i32_0 = arith.constant 0 : i32
    %c0_i32_1 = arith.constant 0 : i32
    return %c0_i32, %c0_i32_0 : i32, i32
  }
  func.func @transform_5(%arg0: i32) -> (i32, i32) {
    %c0_i32 = arith.constant 0 : i32
    %c0_i32_0 = arith.constant 0 : i32
    %c0_i32_1 = arith.constant 0 : i32
    return %c0_i32, %c0_i32_0 : i32, i32
  }
  func.func @transform_6(%arg0: i32) -> (i32, i32) {
    %c0_i32 = arith.constant 0 : i32
    %c0_i32_0 = arith.constant 0 : i32
    %c0_i32_1 = arith.constant 0 : i32
    return %c0_i32, %c0_i32_0 : i32, i32
  }
  func.func @transform_7(%arg0: i32) -> (i32, i32) {
    %c0_i32 = arith.constant 0 : i32
    %c0_i32_0 = arith.constant 0 : i32
    %c0_i32_1 = arith.constant 0 : i32
    return %c0_i32, %c0_i32_0 : i32, i32
  }
  func.func @transform_8(%arg0: i32) -> (i32, i32) {
    %c0_i32 = arith.constant 0 : i32
    %c0_i32_0 = arith.constant 0 : i32
    return %arg0, %c0_i32 : i32, i32
  }
}

</mosaic_0001>

<bundles_post_ra>
// kernel: gaussian_policy_forward.1
= control target key start
LH: loop header
LB: loop body
LE: loop exit
PB: predicated region body
PF: predicated region fallthrough
CT: control target
= control target key end

     0   :  { %13 = vsyncpa [#allocation3], 0  ;;  %s748_s0 = inlined_call_operand.hbm [shape: f32[8,16], index: 0, kind: input, shape index: {}]   ;;  %s749_s1 = inlined_call_operand.vmem [shape: f32[16,32], index: 1, kind: input, shape index: {}]   ;;  %s750_s2 = inlined_call_operand.hbm [shape: f32[1,32], index: 2, kind: input, shape index: {}]   ;;  %s751_s3 = inlined_call_operand.hbm [shape: f32[32,32], index: 3, kind: input, shape index: {}]   ;;  %s752_s4 = inlined_call_operand.hbm [shape: f32[1,32], index: 4, kind: input, shape index: {}]   ;;  %s753_s5 = inlined_call_operand.hbm [shape: f32[32,128], index: 5, kind: input, shape index: {}]   ;;  %s754_s6 = inlined_call_operand.hbm [shape: f32[1,128], index: 6, kind: input, shape index: {}]   ;;  %s755_s7 = inlined_call_operand.vmem [shape: f32[2,128], index: 7, kind: input, shape index: {}]   ;;  %s756_s8 = inlined_call_operand.vmem [shape: f32[8,128], index: 8, kind: output, shape index: {}]  }
   0x1   :  { %14 = vsyncpa [#allocation5], 0 }
   0x2   :  { %15 = vsyncpa [#allocation8], 0 }
   0x3   :  { %16 = vsyncpa [#allocation11], 0  ;;  %s595_s27 = smov [#allocation4]   ;;  %s596_s29 = smov [#allocation7]  }
   0x4   :  { %s35_s28 = sshll.u32 %s595_s27, 4  ;;  %s57_s30 = sshll.u32 %s596_s29, 4  ;;  %s36_s28 = int_to_ptr.vmem [resolvable:$true] %s35_s28  ;;  %s58_s30 = int_to_ptr.vmem [resolvable:$true] %s57_s30 }
   0x5   :  { %s455_s11 = scalar_lea.hbm %s750_s2, 16 }
   0x6   :  { %p456_p0 = scmp.ne.s32.totalorder %s750_s2, %s455_s11  ;;  %p459_p1 = scmp.lt.u32.totalorder %s455_s11, %s750_s2 }
   0x8   :  { %p461_p2 = pnand %p459_p1, %p456_p0 }
   0xa   :  { %464 = shalt.err (!%p461_p2)
}
   0xb   :  { %s465_s16 = scalar_lea.vmem %s36_s28, 16  ;;  %s469_s17 = scalar_lea.vmem %s36_s28, 32 }
   0xc   :  { %p466_p3 = scmp.ne.s32.totalorder %s36_s28, %s465_s16  ;;  %p470_p4 = scmp.lt.s32.totalorder %s36_s28, %s36_s28 }
   0xd   :  { %p471_p5 = scmp.lt.s32.totalorder %s469_s17, %s465_s16 }
   0xf   :  { %p472_p6 = por %p471_p5, %p470_p4 }
  0x11   :  { %p473_p7 = pnand %p472_p6, %p466_p3 }
  0x13   :  { %476 = shalt.err (!%p473_p7)
}
  0x14   :  { %38 = dma.hbm_to_vmem [thread:$0]  %s750_s2, 16, %s36_s28, [#allocation5]  }
  0x15   :  { %s477_s22 = scalar_lea.hbm %s752_s4, 16 }
  0x16   :  { %p478_p8 = scmp.ne.s32.totalorder %s752_s4, %s477_s22  ;;  %p481_p9 = scmp.lt.u32.totalorder %s477_s22, %s752_s4 }
  0x18   :  { %p483_p10 = pnand %p481_p9, %p478_p8 }
  0x1a   :  { %486 = shalt.err (!%p483_p10)
}
  0x1b   :  { %s487_s27 = scalar_lea.vmem %s58_s30, 16  ;;  %s491_s29 = scalar_lea.vmem %s58_s30, 32 }
  0x1c   :  { %p488_p11 = scmp.ne.s32.totalorder %s58_s30, %s487_s27  ;;  %p492_p12 = scmp.lt.s32.totalorder %s58_s30, %s58_s30 }
  0x1d   :  { %p493_p13 = scmp.lt.s32.totalorder %s491_s29, %s487_s27 }
  0x1f   :  { %p494_p0 = por %p493_p13, %p492_p12 }
  0x21   :  { %p495_p1 = pnand %p494_p0, %p488_p11 }
  0x23   :  { %498 = shalt.err (!%p495_p1)
}
  0x24   :  { %60 = dma.hbm_to_vmem [thread:$0]  %s752_s4, 16, %s58_s30, [#allocation8]  }
  0x25   :  { %s597_s9 = smov [#allocation2]   ;;  %s598_s11 = smov [#allocation6]  }
  0x26   :  { %s23_s10 = sshll.u32 %s597_s9, 4  ;;  %s44_s12 = sshll.u32 %s598_s11, 4  ;;  %s24_s10 = int_to_ptr.vmem [resolvable:$true] %s23_s10  ;;  %s675_s12 = int_to_ptr.vmem [resolvable:$true] %s44_s12 }
  0x27   :  { %s499_s15 = scalar_lea.hbm %s748_s0, 128 }
  0x28   :  { %p500_p2 = scmp.ne.s32.totalorder %s748_s0, %s499_s15  ;;  %p503_p3 = scmp.lt.u32.totalorder %s499_s15, %s748_s0 }
  0x2a   :  { %p505_p4 = pnand %p503_p3, %p500_p2 }
  0x2c   :  { %508 = shalt.err (!%p505_p4)
}
  0x2d   :  { %s509_s4 = scalar_lea.vmem %s24_s10, 128  ;;  %p514_p6 = scmp.lt.s32.totalorder %s24_s10, %s24_s10 }
  0x2e   :  { %p510_p5 = scmp.ne.s32.totalorder %s24_s10, %s509_s4  ;;  %p515_p7 = scmp.lt.s32.totalorder %s509_s4, %s509_s4 }
  0x30   :  { %p516_p8 = por %p515_p7, %p514_p6 }
  0x32   :  { %p517_p9 = pnand %p516_p8, %p510_p5 }
  0x34   :  { %520 = shalt.err (!%p517_p9)
}
  0x35   :  { %26 = dma.hbm_to_vmem [thread:$0]  %s748_s0, 128, %s24_s10, [#allocation3]  }
  0x36   :  { %s521_s23 = scalar_lea.hbm %s751_s3, 512 }
  0x37   :  { %p522_p10 = scmp.ne.s32.totalorder %s751_s3, %s521_s23  ;;  %p525_p11 = scmp.lt.u32.totalorder %s521_s23, %s751_s3 }
  0x39   :  { %p527_p12 = pnand %p525_p11, %p522_p10 }
  0x3b   :  { %530 = shalt.err (!%p527_p12)
}
  0x3c   :  { %s531_s29 = scalar_lea.vmem %s675_s12, 512  ;;  %p536_p0 = scmp.lt.s32.totalorder %s675_s12, %s675_s12 }
  0x3d   :  { %p532_p13 = scmp.ne.s32.totalorder %s675_s12, %s531_s29  ;;  %p537_p1 = scmp.lt.s32.totalorder %s531_s29, %s531_s29 }
  0x3f   :  { %p538_p2 = por %p537_p1, %p536_p0 }
  0x41   :  { %p539_p3 = pnand %p538_p2, %p532_p13 }
  0x43   :  { %542 = shalt.err (!%p539_p3)
}
  0x44   :  { %s599_s0 = smov 128   ;;  %s600_s2 = smov 8  }
  0x45   :  { %50 = dma.hbm_to_vmem [thread:$0]  %s751_s3, 512, %s675_s12, [#allocation5], %s599_s0, %s599_s0, %s600_s2  }
  0x46   :  { %s601_s10 = smov [#allocation9]   ;;  %s602_s13 = smov [#allocation10]  }
  0x47   :  { %s66_s11 = sshll.u32 %s601_s10, 4  ;;  %s79_s14 = sshll.u32 %s602_s13, 4  ;;  %s67_s11 = int_to_ptr.vmem [resolvable:$true] %s66_s11  ;;  %s80_s14 = int_to_ptr.vmem [resolvable:$true] %s79_s14 }
  0x48   :  { %s543_s17 = scalar_lea.hbm %s753_s5, 512 }
  0x49   :  { %p544_p4 = scmp.ne.s32.totalorder %s753_s5, %s543_s17  ;;  %p547_p5 = scmp.lt.u32.totalorder %s543_s17, %s753_s5 }
  0x4b   :  { %p549_p6 = pnand %p547_p5, %p544_p4 }
  0x4d   :  { %552 = shalt.err (!%p549_p6)
}
  0x4e   :  { %s553_s3 = scalar_lea.vmem %s67_s11, 512  ;;  %p558_p8 = scmp.lt.s32.totalorder %s67_s11, %s67_s11 }
  0x4f   :  { %p554_p7 = scmp.ne.s32.totalorder %s67_s11, %s553_s3  ;;  %p559_p9 = scmp.lt.s32.totalorder %s553_s3, %s553_s3 }
  0x51   :  { %p560_p10 = por %p559_p9, %p558_p8 }
  0x53   :  { %p561_p11 = pnand %p560_p10, %p554_p7 }
  0x55   :  { %564 = shalt.err (!%p561_p11)
}
  0x56   :  { %72 = dma.hbm_to_vmem [thread:$0]  %s753_s5, 512, %s67_s11, [#allocation8], %s599_s0, %s599_s0, %s600_s2  }
  0x57   :  { %s565_s23 = scalar_lea.hbm %s754_s6, 16 }
  0x58   :  { %p566_p12 = scmp.ne.s32.totalorder %s754_s6, %s565_s23  ;;  %p569_p13 = scmp.lt.u32.totalorder %s565_s23, %s754_s6 }
  0x5a   :  { %p571_p0 = pnand %p569_p13, %p566_p12 }
  0x5c   :  { %574 = shalt.err (!%p571_p0)
}
  0x5d   :  { %s575_s29 = scalar_lea.vmem %s80_s14, 16  ;;  %s579_s28 = scalar_lea.vmem %s80_s14, 32 }
  0x5e   :  { %p576_p1 = scmp.ne.s32.totalorder %s80_s14, %s575_s29  ;;  %p580_p2 = scmp.lt.s32.totalorder %s80_s14, %s80_s14 }
  0x5f   :  { %p581_p3 = scmp.lt.s32.totalorder %s579_s28, %s575_s29 }
  0x61   :  { %p582_p4 = por %p581_p3, %p580_p2 }
  0x63   :  { %p583_p5 = pnand %p582_p4, %p576_p1 }
  0x65   :  { %586 = shalt.err (!%p583_p5)
}
  0x66   :  { %82 = dma.hbm_to_vmem [thread:$0]  %s754_s6, 16, %s80_s14, [#allocation11]  }
  0x67   :  { %587 = dma.done.wait [#allocation3], 128  }
  0x68   :  { %588 = vsyncadd [#allocation3], 4294967168 }
  0x69   :  { %589 = dma.done.wait [#allocation5], 528  }
  0x6a   :  { %590 = vsyncadd [#allocation5], 4294966768 }
  0x6b   :  { %591 = dma.done.wait [#allocation8], 528  }
  0x6c   :  { %592 = vsyncadd [#allocation8], 4294966768 }
  0x6d   :  { %593 = dma.done.wait [#allocation11], 16  }
  0x6e   :  { %594 = vsyncadd [#allocation11], 4294967280  ;;  %v603_v0 = vmov 0.0|0.0   ;;  %vm604_vm0 = vmmov 0   ;;  %v605_v1 = vmov 0.0   ;;  %v104_v2 = vld [vmem:[%s749_s1] sm:$0xff] }
  0x6f   :  { %429 = vmatprep.subr.bf16.mxu0 %v603_v0  ;;  %404 = vmatprep.mubr.msk.f32.mxu0 %vm604_vm0, %v605_v1  ;;  %v105_v3 = vld [vmem:[%s749_s1 + $0x8] sm:$0xff]  ;;  %v188_v5 = vld [vmem:[#allocation6] sm:$0xff]  ;;  %v103_v8 = vld [vmem:[#allocation2] sm:$0xff]  ;;  %vm113_vm1 = vcmask 130048   ;;  %vm199_vm2 = vcmask 261120  }
  0x70   :  { %432 = vmatprep.subr.bf16.mxu1 %v603_v0  ;;  %415 = vmatprep.mubr.msk.f32.mxu1 %vm604_vm0, %v605_v1  ;;  %v430_v4 = vpack.c.bf16 %v105_v3, %v104_v2  ;;  %v189_v6 = vld [vmem:[#allocation6 + $0x8] sm:$0xff]  ;;  %v190_v9 = vld [vmem:[#allocation6 + $0x10] sm:$0xff]  ;;  %v191_v10 = vld [vmem:[#allocation6 + $0x18] sm:$0xff] }
  0x71   :  { %v433_v7 = vpack.c.bf16 %v189_v6, %v188_v5  ;;  %v436_v11 = vpack.c.bf16 %v191_v10, %v190_v9  ;;  %v274_v12 = vld [vmem:[#allocation9] sm:$0xff]  ;;  %v275_v13 = vld [vmem:[#allocation9 + $0x8] sm:$0xff]  ;;  %v379_v15 = vld [vmem:[#allocation4] ss:$0 sm:$0xff] }
  0x72   :  { %431 = vmatpush3.bf16.msra.mxu0 %v430_v4  ;;  %v439_v14 = vpack.c.bf16 %v275_v13, %v274_v12  ;;  %v276_v20 = vld [vmem:[#allocation9 + $0x10] sm:$0xff]  ;;  %v277_v21 = vld [vmem:[#allocation9 + $0x18] sm:$0xff]  ;;  %v383_v28 = vld [vmem:[#allocation10] ss:$0 sm:$0xff] }
  0x73   :  { %434 = vmatpush3.bf16.msra.mxu1 %v433_v7  ;;  %438 = vmatprep.subr.bf16.mxu0 %v603_v0  ;;  %v442_v22 = vpack.c.bf16 %v277_v21, %v276_v20  ;;  %v381_v23 = vld [vmem:[#allocation7] ss:$0 sm:$0xff]  ;;  %v385_v30 = vld [vmem:[%s755_s7] ss:$0 sm:$0xff]  ;;  %v386_v33 = vld [vmem:[%s755_s7 + $0x1] ss:$0 sm:$0xff] }
  0x74   :  { %435 = vmatprep.subr.bf16.mxu1 %v603_v0 }
  0x75   :  { %405 = vmatmul.mubr.msk.f32.vlgmr.msra.gmra.mrb[0].mxu0 %vm113_vm1, %v103_v8 }
  0x76   :  { %426 = vmatprep.mubr.msk.f32.mxu0 %vm604_vm0, %v605_v1  ;;  %440 = vmatpush3.bf16.msra.mxu0 %v439_v14 }
  0x77   :  { %437 = vmatpush3.bf16.msra.mxu1 %v436_v11  ;;  %441 = vmatprep.subr.bf16.mxu0 %v603_v0 }
  0x7a   :  { %443 = vmatpush3.bf16.msra.mxu0 %v442_v22 }
 0x148   :  { %v183_v16 = vpop.f32.mrb[0].mxu0 }
 0x149   :  { %v184_v17 = vadd.f32 %v379_v15, %v183_v16  ;;  %v406_v18 = vpop.f32.mrb[1].mxu0 }
 0x14b   :  { %v187_v19 = vmax.f32 %v184_v17, 0.0 }
 0x14d   :  { %416 = vmatmul.mubr.msk.f32.vlgmr.msra.gmra.mrb[0].mxu1 %vm199_vm2, %v187_v19 }
 0x220   :  { %v269_v24 = vpop.f32.mrb[0].mxu1 }
 0x221   :  { %v270_v25 = vadd.f32 %v381_v23, %v269_v24  ;;  %v417_v26 = vpop.f32.mrb[1].mxu1 }
 0x223   :  { %v273_v27 = vmax.f32 %v270_v25, 0.0 }
 0x225   :  { %427 = vmatmul.mubr.msk.f32.vlgmr.msra.gmra.mrb[2].mxu0 %vm199_vm2, %v273_v27 }
 0x2f8   :  { %v354_v29 = vpop.f32.mrb[2].mxu0 }
 0x2f9   :  { %v355_v31 = vadd.f32 %v383_v28, %v354_v29  ;;  %v428_v32 = vpop.f32.mrb[3].mxu0 }
 0x2fb   :  { %v364_v34 = vmax.f32 %v355_v31, %v385_v30 }
 0x2fd   :  { %v369_v35 = vmin.f32 %v364_v34, %v386_v33 }
 0x2ff   :  { %370 = vst [vmem:[%s756_s8] sm:$0xff] %v369_v35 }
 0x300   :  { %375 = vsyncpa [#allocation3], 1 }
 0x301   :  { %376 = vsyncpa [#allocation5], 1 }
 0x302   :  { %377 = vsyncpa [#allocation8], 1 }
 0x303   :  { %378 = vsyncpa [#allocation11], 1 }

</bundles_post_ra>
